<compile_context>
chip_gen: v5e
topology: v5e:2x2
jax: 0.10.0
libtpu: 0.0.40
codegen_flags: <defaults>
</compile_context>

<pallas_src>
import math
import functools

import jax
import jax.numpy as jnp
from jax.experimental import pallas as pl
from jax.experimental.pallas import tpu as pltpu


def _round_up(a, b):
    return (a + b - 1) // b * b


def _label_smoothing_kernel(x_ref, tgt_ref, msk_ref, loss_ref, msum_ref, *,
                            n_rows, tile_rows, tiles_per_core,
                            confidence, smooth_val, const_c):
    """One grid step: a (tile_rows, V) tile of log-probs + (tile_rows, 1) tgt/mask.

    Accumulates per-row weighted-loss and mask partial sums into the two
    VMEM-resident (tile_rows, 1) output blocks (one pair per core).
    """
    c = pl.program_id(0)          # core split ("parallel")
    i = pl.program_id(1)          # row-tile loop ("arbitrary" / sequential)

    @pl.when(i == 0)
    def _():
        loss_ref[...] = jnp.zeros_like(loss_ref)
        msum_ref[...] = jnp.zeros_like(msum_ref)

    x = x_ref[...].astype(jnp.float32)          # (TR, V); bf16 stays bf16 in HBM, upcast per tile
    tgt = tgt_ref[...]                          # (TR, 1) int32
    m = msk_ref[...].astype(jnp.float32)        # (TR, 1)

    col = jax.lax.broadcasted_iota(jnp.int32, x.shape, 1)
    is_tgt = col == tgt                         # (TR, V)

    # Closed-form KL row sums: one select + one mul + ONE lane reduction.
    # (VPU has slack at the HBM roofline; XLU is the scarcer unit, so keep a
    #  single cross-lane reduce per tile.)
    w = jnp.where(is_tgt, confidence, smooth_val)                       # (TR, V)
    wx = jnp.sum(w * x, axis=1, keepdims=True)                          # (TR, 1)
    row_loss = const_c - wx

    # Ragged-tail / replicated-tile handling: zero rows whose global index >= N.
    row0 = (c * tiles_per_core + i) * tile_rows
    ridx = row0 + jax.lax.broadcasted_iota(jnp.int32, (tile_rows, 1), 0)
    valid = ridx < n_rows

    loss_ref[...] += jnp.where(valid, row_loss * m, 0.0)
    msum_ref[...] += jnp.where(valid, m, 0.0)


def _choose_tile_rows(n_rows, v, itemsize, num_cores,
                      target_bytes=2 << 20, max_rows=4096):
    """Pick a row-tile that makes the x tile ~2 MiB (capped by per-core work)."""
    rows = max(8, target_bytes // max(1, v * itemsize))
    rows = min(rows, max_rows, _round_up(pl.cdiv(n_rows, num_cores), 8))
    return int(max(8, (rows // 8) * 8))


def label_smoothing_loss(inp, target, mask, smoothing=0.0, *,
                         num_cores=2, tile_rows=None):
    """JAX wrapper reproducing LabelSmoothing.forward semantics."""
    # ---- glue: mirror the PyTorch reshape / truncation logic (views only) ----
    if target.ndim == 3:
        target = target.reshape(-1, target.shape[2])
        mask = mask.reshape(-1, mask.shape[2])
    T = inp.shape[1]
    target = target[:, :T]
    mask = mask[:, :T]

    V = inp.shape[-1]
    x = inp.reshape(-1, V)                         # (N, V), native dtype — no extra HBM pass
    tgt = target.reshape(-1, 1).astype(jnp.int32)  # (N, 1) (tiny)
    msk = mask.reshape(-1, 1)                      # (N, 1) (tiny)
    N = x.shape[0]

    confidence = 1.0 - smoothing
    smooth_val = smoothing / (V - 1) if V > 1 else 0.0  # V==1 degenerate, matches reference
    const_c = 0.0
    if confidence > 0.0:
        const_c += confidence * math.log(confidence)
    if smooth_val > 0.0:
        const_c += (V - 1) * smooth_val * math.log(smooth_val)

    if tile_rows is None:
        tile_rows = _choose_tile_rows(N, V, x.dtype.itemsize, num_cores)
    n_blocks = pl.cdiv(N, tile_rows)
    tiles_per_core = pl.cdiv(n_blocks, num_cores)

    def row_block(c, i):
        # Clamp so fully out-of-range tiles just re-read the last valid block;
        # their rows are zeroed in-kernel via the row-index validity mask.
        return (jnp.minimum(c * tiles_per_core + i, n_blocks - 1), 0)

    kernel = functools.partial(
        _label_smoothing_kernel,
        n_rows=N, tile_rows=tile_rows, tiles_per_core=tiles_per_core,
        confidence=float(confidence), smooth_val=float(smooth_val),
        const_c=float(const_c))

    # VMEM budget: double-buffered native-dtype x tile + f32 working set + slack.
    tile_native = tile_rows * V * x.dtype.itemsize
    tile_f32 = tile_rows * V * 4
    vmem_limit = int(min(48 << 20, max(32 << 20, 4 * tile_native + 6 * tile_f32)))

    loss_part, mask_part = pl.pallas_call(
        kernel,
        out_shape=(jax.ShapeDtypeStruct((num_cores * tile_rows, 1), jnp.float32),
                   jax.ShapeDtypeStruct((num_cores * tile_rows, 1), jnp.float32)),
        grid_spec=pltpu.PrefetchScalarGridSpec(
            num_scalar_prefetch=0,
            grid=(num_cores, tiles_per_core),
            in_specs=[
                pl.BlockSpec((tile_rows, V), row_block),
                pl.BlockSpec((tile_rows, 1), row_block),
                pl.BlockSpec((tile_rows, 1), row_block),
            ],
            out_specs=[
                pl.BlockSpec((tile_rows, 1), lambda c, i: (c, 0)),
                pl.BlockSpec((tile_rows, 1), lambda c, i: (c, 0)),
            ],
        ),
        compiler_params=pltpu.CompilerParams(
            dimension_semantics=("parallel", "arbitrary"),
            vmem_limit_bytes=vmem_limit),
    )(x, tgt, msk)

    # Tiny final reduction + divide in the wrapper (per-core partial sums).
    return loss_part.sum() / mask_part.sum()


def _reference(inp, target, mask, smoothing):
    """Pure-JAX reference mirroring the PyTorch module, for validation."""
    confidence = 1.0 - smoothing
    if target.ndim == 3:
        target = target.reshape(-1, target.shape[2])
        mask = mask.reshape(-1, mask.shape[2])
    T = inp.shape[1]
    target = target[:, :T]
    mask = mask[:, :T]
    V = inp.shape[-1]
    x = inp.reshape(-1, V).astype(jnp.float32)
    t = target.reshape(-1)
    m = mask.reshape(-1).astype(jnp.float32)
    smooth_val = smoothing / (V - 1)
    true_dist = jnp.full_like(x, smooth_val)
    true_dist = true_dist.at[jnp.arange(x.shape[0]), t].set(confidence)
    kl = jnp.where(true_dist > 0,
                   true_dist * (jnp.log(jnp.where(true_dist > 0, true_dist, 1.0)) - x),
                   0.0)
    return (kl.sum(1) * m).sum() / m.sum()


if __name__ == "__main__":
    key = jax.random.PRNGKey(0)
    k1, k2, k3, k4, k5, k6 = jax.random.split(key, 6)

    # Case 1: f32 log-probs, evenly divisible row count.
    B, T, V = 2, 8, 32
    smoothing = 0.1
    logits = jax.random.normal(k1, (B, T, V), dtype=jnp.float32)
    log_probs = jax.nn.log_softmax(logits, axis=-1)     # KLDivLoss expects log-input
    target = jax.random.randint(k2, (B, T), 0, V, dtype=jnp.int32)
    mask = (jax.random.uniform(k3, (B, T)) > 0.25).astype(jnp.float32)

    loss = jax.block_until_ready(
        label_smoothing_loss(log_probs, target, mask, smoothing=smoothing))
    ref = _reference(log_probs, target, mask, smoothing)
    assert jnp.allclose(loss, ref, rtol=1e-5, atol=1e-5), (loss, ref)

    # Case 2: bf16 log-probs, ragged row count (exercises tail masking +
    # clamped out-of-range tiles + in-kernel upcast).
    B2, T2, V2 = 3, 7, 48
    logits2 = jax.random.normal(k4, (B2, T2, V2), dtype=jnp.float32)
    log_probs2 = jax.nn.log_softmax(logits2, axis=-1).astype(jnp.bfloat16)
    target2 = jax.random.randint(k5, (B2, T2), 0, V2, dtype=jnp.int32)
    mask2 = (jax.random.uniform(k6, (B2, T2)) > 0.25).astype(jnp.float32)

    loss2 = jax.block_until_ready(
        label_smoothing_loss(log_probs2, target2, mask2, smoothing=0.2))
    ref2 = _reference(log_probs2, target2, mask2, 0.2)
    assert jnp.allclose(loss2, ref2, rtol=1e-4, atol=1e-4), (loss2, ref2)

    print("KERNEL_OK")
</pallas_src>

<mosaic_0001>
module attributes {stable_mosaic.version = 11 : i64} {
  func.func @_label_smoothing_kernel(%arg0: i32, %arg1: i32, %arg2: memref<8x32xf32, #tpu.memory_space<vmem>>, %arg3: memref<8x1xi32, #tpu.memory_space<vmem>>, %arg4: memref<8x1xf32, #tpu.memory_space<vmem>>, %arg5: memref<8x1xf32, #tpu.memory_space<vmem>>, %arg6: memref<8x1xf32, #tpu.memory_space<vmem>>) attributes {dimension_semantics = [#tpu.dimension_semantics<parallel>, #tpu.dimension_semantics<arbitrary>], iteration_bounds = array<i64: 2, 1>, scalar_prefetch = 0 : i64, scratch_operands = 0 : i64, tpu.core_type = #tpu.core_type<tc>, window_params = [{transform_indices = @transform_0, window_bounds = array<i64: 8, 32>}, {transform_indices = @transform_1, window_bounds = array<i64: 8, 1>}, {transform_indices = @transform_2, window_bounds = array<i64: 8, 1>}, {transform_indices = @transform_3, window_bounds = array<i64: 8, 1>}, {transform_indices = @transform_4, window_bounds = array<i64: 8, 1>}]} {
    %c0_i32 = arith.constant 0 : i32
    %0 = arith.cmpi eq, %arg1, %c0_i32 : i32
    %1 = arith.extui %0 : i1 to i32
    %c0_i32_0 = arith.constant 0 : i32
    %2 = arith.cmpi ne, %1, %c0_i32_0 : i32
    scf.if %2 {
      %cst_19 = arith.constant 0.000000e+00 : f32
      %36 = vector.broadcast %cst_19 : f32 to vector<8x1xf32>
      %c0_20 = arith.constant 0 : index
      %c0_21 = arith.constant 0 : index
      %37 = vector.load %arg5[%c0_20, %c0_21] : memref<8x1xf32, #tpu.memory_space<vmem>>, vector<8x1xf32>
      tpu.vector_store %arg5[%c0_20, %c0_21], %36 {strides = array<i32>} : memref<8x1xf32, #tpu.memory_space<vmem>>, vector<8x1xf32>,
      %cst_22 = arith.constant 0.000000e+00 : f32
      %38 = vector.broadcast %cst_22 : f32 to vector<8x1xf32>
      %c0_23 = arith.constant 0 : index
      %c0_24 = arith.constant 0 : index
      %39 = vector.load %arg6[%c0_23, %c0_24] : memref<8x1xf32, #tpu.memory_space<vmem>>, vector<8x1xf32>
      tpu.vector_store %arg6[%c0_23, %c0_24], %38 {strides = array<i32>} : memref<8x1xf32, #tpu.memory_space<vmem>>, vector<8x1xf32>,
    } else {
    }
    %c0 = arith.constant 0 : index
    %c0_1 = arith.constant 0 : index
    %3 = vector.load %arg2[%c0, %c0_1] : memref<8x32xf32, #tpu.memory_space<vmem>>, vector<8x32xf32>
    %c0_2 = arith.constant 0 : index
    %c0_3 = arith.constant 0 : index
    %4 = vector.load %arg3[%c0_2, %c0_3] : memref<8x1xi32, #tpu.memory_space<vmem>>, vector<8x1xi32>
    %c0_4 = arith.constant 0 : index
    %c0_5 = arith.constant 0 : index
    %5 = vector.load %arg4[%c0_4, %c0_5] : memref<8x1xf32, #tpu.memory_space<vmem>>, vector<8x1xf32>
    %6 = tpu.iota {dimensions = array<i32: 1>} : vector<8x32xi32>
    %7 = vector.broadcast %4 : vector<8x1xi32> to vector<8x32xi32>
    %8 = arith.cmpi eq, %6, %7 : vector<8x32xi32>
    %cst = arith.constant 0.899999976 : f32
    %cst_6 = arith.constant 0.0032258064 : f32
    %9 = vector.broadcast %cst : f32 to vector<8x32xf32>
    %10 = vector.broadcast %cst_6 : f32 to vector<8x32xf32>
    %11 = arith.select %8, %9, %10 : vector<8x32xi1>, vector<8x32xf32>
    %12 = arith.mulf %11, %3 : vector<8x32xf32>
    %cst_7 = arith.constant dense<0.000000e+00> : vector<8xf32>
    %13 = vector.multi_reduction <add>, %12, %cst_7 [1] : vector<8x32xf32> to vector<8xf32>
    %14 = vector.shape_cast %13 : vector<8xf32> to vector<8x1xf32>
    %cst_8 = arith.constant -0.668481708 : f32
    %15 = vector.broadcast %cst_8 : f32 to vector<8x1xf32>
    %16 = arith.subf %15, %14 : vector<8x1xf32>
    %c1_i32 = arith.constant 1 : i32
    %17 = arith.muli %arg0, %c1_i32 : i32
    %18 = arith.addi %17, %arg1 : i32
    %c8_i32 = arith.constant 8 : i32
    %19 = arith.muli %18, %c8_i32 : i32
    %20 = tpu.iota {dimensions = array<i32: 0>} : vector<8x1xi32>
    %21 = vector.broadcast %19 : i32 to vector<8x1xi32>
    %22 = arith.addi %21, %20 : vector<8x1xi32>
    %c16_i32 = arith.constant 16 : i32
    %23 = vector.broadcast %c16_i32 : i32 to vector<8x1xi32>
    %24 = arith.cmpi slt, %22, %23 : vector<8x1xi32>
    %c0_9 = arith.constant 0 : index
    %c0_10 = arith.constant 0 : index
    %25 = vector.load %arg5[%c0_9, %c0_10] : memref<8x1xf32, #tpu.memory_space<vmem>>, vector<8x1xf32>
    %26 = arith.mulf %16, %5 : vector<8x1xf32>
    %cst_11 = arith.constant 0.000000e+00 : f32
    %27 = vector.broadcast %cst_11 : f32 to vector<8x1xf32>
    %28 = arith.select %24, %26, %27 : vector<8x1xi1>, vector<8x1xf32>
    %29 = arith.addf %25, %28 : vector<8x1xf32>
    %c0_12 = arith.constant 0 : index
    %c0_13 = arith.constant 0 : index
    %30 = vector.load %arg5[%c0_12, %c0_13] : memref<8x1xf32, #tpu.memory_space<vmem>>, vector<8x1xf32>
    tpu.vector_store %arg5[%c0_12, %c0_13], %29 {strides = array<i32>} : memref<8x1xf32, #tpu.memory_space<vmem>>, vector<8x1xf32>,
    %c0_14 = arith.constant 0 : index
    %c0_15 = arith.constant 0 : index
    %31 = vector.load %arg6[%c0_14, %c0_15] : memref<8x1xf32, #tpu.memory_space<vmem>>, vector<8x1xf32>
    %cst_16 = arith.constant 0.000000e+00 : f32
    %32 = vector.broadcast %cst_16 : f32 to vector<8x1xf32>
    %33 = arith.select %24, %5, %32 : vector<8x1xi1>, vector<8x1xf32>
    %34 = arith.addf %31, %33 : vector<8x1xf32>
    %c0_17 = arith.constant 0 : index
    %c0_18 = arith.constant 0 : index
    %35 = vector.load %arg6[%c0_17, %c0_18] : memref<8x1xf32, #tpu.memory_space<vmem>>, vector<8x1xf32>
    tpu.vector_store %arg6[%c0_17, %c0_18], %34 {strides = array<i32>} : memref<8x1xf32, #tpu.memory_space<vmem>>, vector<8x1xf32>,
    return
  }
  func.func @transform_0(%arg0: i32, %arg1: i32) -> (i32, i32) {
    %c1_i32 = arith.constant 1 : i32
    %0 = arith.muli %arg0, %c1_i32 : i32
    %1 = arith.addi %0, %arg1 : i32
    %c1_i32_0 = arith.constant 1 : i32
    %2 = arith.minsi %1, %c1_i32_0 : i32
    %c0_i32 = arith.constant 0 : i32
    %c0_i32_1 = arith.constant 0 : i32
    return %2, %c0_i32 : i32, i32
  }
  func.func @transform_1(%arg0: i32, %arg1: i32) -> (i32, i32) {
    %c1_i32 = arith.constant 1 : i32
    %0 = arith.muli %arg0, %c1_i32 : i32
    %1 = arith.addi %0, %arg1 : i32
    %c1_i32_0 = arith.constant 1 : i32
    %2 = arith.minsi %1, %c1_i32_0 : i32
    %c0_i32 = arith.constant 0 : i32
    %c0_i32_1 = arith.constant 0 : i32
    return %2, %c0_i32 : i32, i32
  }
  func.func @transform_2(%arg0: i32, %arg1: i32) -> (i32, i32) {
    %c1_i32 = arith.constant 1 : i32
    %0 = arith.muli %arg0, %c1_i32 : i32
    %1 = arith.addi %0, %arg1 : i32
    %c1_i32_0 = arith.constant 1 : i32
    %2 = arith.minsi %1, %c1_i32_0 : i32
    %c0_i32 = arith.constant 0 : i32
    %c0_i32_1 = arith.constant 0 : i32
    return %2, %c0_i32 : i32, i32
  }
  func.func @transform_3(%arg0: i32, %arg1: i32) -> (i32, i32) {
    %c0_i32 = arith.constant 0 : i32
    %c0_i32_0 = arith.constant 0 : i32
    return %arg0, %c0_i32 : i32, i32
  }
  func.func @transform_4(%arg0: i32, %arg1: i32) -> (i32, i32) {
    %c0_i32 = arith.constant 0 : i32
    %c0_i32_0 = arith.constant 0 : i32
    return %arg0, %c0_i32 : i32, i32
  }
}

</mosaic_0001>

<bundles_post_ra>
// kernel: tpu_custom_call.1
= control target key start
LH: loop header
LB: loop body
LE: loop exit
PB: predicated region body
PF: predicated region fallthrough
CT: control target
= control target key end

     0   :  { %s571_s15 = smov 0   ;;  %s573_s16 = smov 0   ;;  %s624_s0 = inlined_call_operand.vmem [shape: f32[16,32], index: 0, kind: input, shape index: {}]   ;;  %s625_s1 = inlined_call_operand.vmem [shape: s32[16,1], index: 1, kind: input, shape index: {}]   ;;  %s626_s2 = inlined_call_operand.vmem [shape: f32[16,1], index: 2, kind: input, shape index: {}]   ;;  %s627_s3 = inlined_call_operand.vmem [shape: f32[16,1], index: 3, kind: output, shape index: {0}]   ;;  %s628_s4 = inlined_call_operand.vmem [shape: f32[16,1], index: 4, kind: output, shape index: {1}]  }
   0x1   :  { %s575_s17 = smov 0  }
   0x2 LB: > { %s27_s18 = sadd.s32 1, %s537_s16  ;;  %p473_p0 = scmp.ge.s32.totalorder %s541_s17, 1  ;;  %s541_s17 = sphi %s575_s17, %s15_s17   ;;  %s537_s16 = sphi %s573_s16, %s630_s16   ;;  %s533_s15 = sphi %s571_s15, %s629_s15  }
   0x3   : > { %p29_p1 = scmp.ge.s32.totalorder %s27_s18, 2  ;;  %p230_p2 = scmp.lt.s32.totalorder %s541_s17, 3 }
   0x5   : > { %s632_s18 = smov (%p29_p1, %s27_s18), 0  ;;  %p231_p3 = pnand %p473_p0, %p230_p2 }
   0x6   : > { %p276_p4 = scmp.lt.s32.totalorder (!%p231_p3), %s533_s15, 1  ;;  %s488_s26 = sshll.u32 (!%p231_p3), %s533_s15, 3 }
   0x7   : > { %234 = sbr.rel (%p231_p3) target bundleno = 263 (0x107), region = 32 }
   0xc   : > { %v543_v0 = vmov 0   ;;  %s277_s19 = scalar_select %p276_p4, %s533_s15, 1  ;;  %v323_v2 = vlaneseq  ;;  %vm317_vm0 = vcmask 7168   ;;  %v340_v4 = vstv %s488_s26 }
   0xd   : > { %518 = vset.pattern.permute.xlu0 %v543_v0  ;;  %v544_v5 = vmov 0.0   ;;  %v545_v14 = vmov 0.0032258064   ;;  %vm331_vm3 = vcmask 261120  }
   0xe   : > { %s279_s20 = scalar_select %p276_p4, %s277_s19, 1  ;;  %v339_v3 = vshrl.u32 %v323_v2, 7  ;;  %v324_v11 = vand.u32 127, %v323_v2 }
   0xf   : > { %s486_s25 = sshll.u32 %s277_s19, 3 }
  0x10   : > { %s477_s21 = sshll.u32 %s279_s20, 3  ;;  %s595_s29 = scalar_lea.vmem %s627_s3, %s486_s25  ;;  %v341_v6 = vadd.s32 %v340_v4, %v339_v3 }
  0x11   : > { %s291_s24 = scalar_lea.vmem %s625_s1, %s477_s21  ;;  %s312_s6 = scalar_lea.vmem %s628_s4, %s486_s25  ;;  %318 = vst.msk [vmem:[%s595_s29] sm:$0xff] %vm317_vm0, %v544_v5 }
  0x12   : > { %v321_v1 = vld [vmem:[%s291_s24] sm:$0xff]  ;;  %319 = vst.msk [vmem:[%s312_s6] sm:$0xff] %vm317_vm0, %v544_v5  ;;  %s301_s9 = scalar_lea.vmem %s626_s2, %s477_s21  ;;  %vm342_vm1 = vcmp.lt.s32.totalorder %v341_v6, 16  ;;  %s281_s12 = scalar_lea.vmem %s624_s0, %s477_s21 }
  0x13   : > { %326 = vperm.xlu0 %518, %v321_v1   ;;  %v322_v7 = vld [vmem:[%s301_s9] sm:$0xff] }
  0x14   : > { %v350_v8 = vsel %vm342_vm1, %v322_v7, 0.0  ;;  %v320_v13 = vld [vmem:[%s281_s12] sm:$0xff] }
  0x18   : > { %v343_v20 = vld [vmem:[%s595_s29] sm:$0xff] }
  0x19   : > { %v349_v9 = vld [vmem:[%s312_s6] sm:$0xff] }
  0x1a   : > { %v351_v10 = vadd.f32 %v350_v8, %v349_v9 }
  0x1c   : > { %352 = vst.msk [vmem:[%s312_s6] sm:$0xff] %vm317_vm0, %v351_v10 }
  0x85   : > { %v327_v12 = vpop.permute.xlu0 %326 }
  0x86   : > { %vm328_vm2 = vcmp.eq.s32.totalorder %v324_v11, %v327_v12 }
  0x87   : > { %v329_v15 = vsel %vm328_vm2, 0.9, %v545_v14 }
  0x88   : > { %v330_v16 = vmul.f32 %v329_v15, %v320_v13 }
  0x8a   : > { %v332_v17 = vsel %vm331_vm3, %v330_v16, 0.0 }
  0x8b   : > { %333 = vadd.xlane.f32.xlu0 %v332_v17 }
  0xfe   : > { %v334_v18 = vpop.xlane.xlu0 %333 }
  0xff   : > { %v335_v19 = vsub.f32 -0.6684817, %v334_v18 }
 0x101   : > { %v344_v21 = vmul.f32 %v335_v19, %v322_v7 }
 0x103   : > { %v345_v22 = vsel %vm342_vm1, %v344_v21, 0.0 }
 0x104   : > { %v346_v23 = vadd.f32 %v345_v22, %v343_v20 }
 0x106   : > { %348 = vst.msk [vmem:[%s595_s29] sm:$0xff] %vm317_vm0, %v346_v23 }
 0x107 PF: > { %s15_s17 = sadd.s32 1, %s541_s17   ;;  %s629_s15 = smov %s537_s16 }
 0x108   : > { %p12_p5 = scmp.ge.s32.totalorder %s15_s17, 4   ;;  %s630_s16 = smov %s632_s18 }
 0x10a   :  { %14 = sbr.rel (!%p12_p5) target bundleno = 2 (0x2), region = 84 }

</bundles_post_ra>
